<compile_context>
chip_gen: v7x
topology: tpu7x:2x2x1
jax: 0.10.0
libtpu: 0.0.40
codegen_flags: <defaults>
</compile_context>

<pallas_src>
import functools
import operator

import jax
import jax.numpy as jnp
from jax.experimental import pallas as pl
from jax.experimental.pallas import tpu as pltpu

H1_LOGICAL, H2_LOGICAL = 400, 300      # PyTorch layer widths
H1_PAD, H2_PAD = 512, 384              # lane-aligned (multiples of 128)


def critic_dense_kernel(xu_ref, w1_ref, b1_ref, w2x_ref, w2u_ref, b2_ref,
                        w3_ref, b3_ref, out_ref):
    # Activations stay f32 for all VPU math; only the MXU operands are bf16.
    xu_bf = xu_ref[...].astype(jnp.bfloat16)                    # (bB, S+A)

    # ---- Layer 1: xu @ W1pad (A zero rows) -> 512 (padded 400), ReLU ---------
    h1 = jnp.dot(xu_bf, w1_ref[...],
                 preferred_element_type=jnp.float32) + b1_ref[...]
    h1 = jnp.maximum(h1, 0.0)                                   # padded cols stay 0

    # ---- Layer 2: split concat matmul, ReLU ----------------------------------
    #   cat([h1, u]) @ W2 == h1 @ W2x + xu @ W2u_pad (S zero rows) -- exact.
    h2 = (jnp.dot(h1.astype(jnp.bfloat16), w2x_ref[...],
                  preferred_element_type=jnp.float32)
          + jnp.dot(xu_bf, w2u_ref[...], preferred_element_type=jnp.float32)
          + b2_ref[...])
    h2 = jnp.maximum(h2, 0.0)                                   # padded cols stay 0

    # ---- Layer 3: 384 -> 1.  N=1 matmul replaced by VPU mul + lane reduce ----
    q = jnp.sum(h2 * w3_ref[...], axis=-1, keepdims=True) + b3_ref[0]
    out_ref[...] = q.astype(out_ref.dtype)


def _pick_batch_block(B, block_b):
    """Batch tile: full array if tiny; else split into >=2 blocks (v7x megacore)."""
    if B <= 8:
        return B                               # block == full dim (legal layout)
    if B <= 2 * block_b:
        half = (B + 1) // 2                    # 2 blocks so both TCs get work on v7x
        return max(8, ((half + 7) // 8) * 8)
    return block_b


def critic_dense_forward(x, u, params, *, block_b=2048):
    """x: (B, state_dim_flat) f32, u: (B, action_dim) f32 -> (B, 1) f32."""
    B = x.shape[0]
    w1, b1, w2x, w2u, b2, w3, b3 = params

    # Single activation stream: one DMA / index_map per step instead of two.
    xu = jnp.concatenate([x, u], axis=1)
    SA = xu.shape[1]

    bB = _pick_batch_block(B, block_b)
    grid = (pl.cdiv(B, bB),)

    def resident(shape):                       # weights/biases: same block every step
        return pl.BlockSpec(shape, lambda i: (0, 0))

    return pl.pallas_call(
        critic_dense_kernel,
        out_shape=jax.ShapeDtypeStruct((B, 1), jnp.float32),
        grid=grid,
        in_specs=[
            pl.BlockSpec((bB, SA), lambda i: (i, 0)),           # xu  (bB, S+A) f32
            resident(w1.shape),                                 # w1  (S+A, 512) bf16
            resident(b1.shape),                                 # b1  (1, 512)   f32
            resident(w2x.shape),                                # w2x (512, 384) bf16
            resident(w2u.shape),                                # w2u (S+A, 384) bf16
            resident(b2.shape),                                 # b2  (1, 384)   f32
            resident(w3.shape),                                 # w3  (1, 384)   f32
            pl.BlockSpec(memory_space=pltpu.MemorySpace.SMEM),  # b3 scalar (1,) f32
        ],
        out_specs=pl.BlockSpec((bB, 1), lambda i: (i, 0)),
        compiler_params=pltpu.CompilerParams(
            dimension_semantics=("parallel",),   # megacore batch split on v7x
            # ~11 MiB live at bB=2048; 32 MiB is explicit (v5e default is 16 MiB)
            # and well under v7x's 64 MiB per-TC VMEM.
            vmem_limit_bytes=32 * 1024 * 1024,
        ),
    )(xu, w1, b1, w2x, w2u, b2, w3, b3)


def init_params(key, state_dim_flat, action_dim):
    """nn.Linear-style init, padded to lane-aligned widths, weights in bf16."""
    def linear(key, fan_in, fan_out):
        kw, kb = jax.random.split(key)
        bound = 1.0 / jnp.sqrt(fan_in)
        w = jax.random.uniform(kw, (fan_in, fan_out), jnp.float32, -bound, bound)
        b = jax.random.uniform(kb, (1, fan_out), jnp.float32, -bound, bound)
        return w, b

    S, A = state_dim_flat, action_dim
    SA = S + A
    k1, k2, k3 = jax.random.split(key, 3)
    w1, b1 = linear(k1, S, H1_LOGICAL)
    w2, b2 = linear(k2, H1_LOGICAL + A, H2_LOGICAL)
    w3, b3 = linear(k3, H2_LOGICAL, 1)

    # Split W2 along its input axis: rows [0:400) multiply h1, rows [400:) multiply u.
    w2x, w2u = w2[:H1_LOGICAL, :], w2[H1_LOGICAL:, :]

    # Zero-padding (numerically exact):
    #   * features 400->512, 300->384 (lane alignment),
    #   * W1 gets A zero rows (so xu @ W1pad == x @ W1),
    #   * W2u gets S zero rows on top (so xu @ W2u_pad == u @ W2u).
    w1p = jnp.zeros((SA, H1_PAD), jnp.float32).at[:S, :H1_LOGICAL].set(w1)
    b1p = jnp.zeros((1, H1_PAD), jnp.float32).at[:, :H1_LOGICAL].set(b1)
    w2xp = jnp.zeros((H1_PAD, H2_PAD), jnp.float32).at[:H1_LOGICAL, :H2_LOGICAL].set(w2x)
    w2up = jnp.zeros((SA, H2_PAD), jnp.float32).at[S:, :H2_LOGICAL].set(w2u)
    b2p = jnp.zeros((1, H2_PAD), jnp.float32).at[:, :H2_LOGICAL].set(b2)
    w3p = jnp.zeros((1, H2_PAD), jnp.float32).at[:, :H2_LOGICAL].set(w3.T)   # row vector

    # Matmul weights to bf16 (fed straight to the MXU); biases and w3 (VPU) stay f32.
    return (w1p.astype(jnp.bfloat16), b1p,
            w2xp.astype(jnp.bfloat16), w2up.astype(jnp.bfloat16), b2p,
            w3p, b3.reshape((1,)))


def reference_forward(x, u, params):
    """Pure-JAX reference mirroring the kernel math (bf16 MXU operands, f32 accum)."""
    w1, b1, w2x, w2u, b2, w3, b3 = params
    xu = jnp.concatenate([x, u], axis=1)
    xu_bf = xu.astype(jnp.bfloat16)
    h1 = jnp.maximum(
        jnp.dot(xu_bf, w1, preferred_element_type=jnp.float32) + b1, 0.0)
    h2 = jnp.maximum(
        jnp.dot(h1.astype(jnp.bfloat16), w2x, preferred_element_type=jnp.float32)
        + jnp.dot(xu_bf, w2u, preferred_element_type=jnp.float32) + b2, 0.0)
    return jnp.sum(h2 * w3, axis=-1, keepdims=True) + b3[0]


if __name__ == "__main__":
    state_dim = (3, 8)          # CriticDense flattens this: 3*8 = 24
    action_dim = 4
    state_dim_flat = functools.reduce(operator.mul, state_dim, 1)

    key = jax.random.PRNGKey(0)
    kx, ku, kp, kx2, ku2 = jax.random.split(key, 5)
    params = init_params(kp, state_dim_flat, action_dim)

    # Case 1: tiny batch (single block / grid=(1,)).
    batch = 2
    x = jax.random.normal(kx, (batch, state_dim_flat), jnp.float32)
    u = jax.random.normal(ku, (batch, action_dim), jnp.float32)
    out = jax.block_until_ready(critic_dense_forward(x, u, params))
    ref = reference_forward(x, u, params)
    assert out.shape == (batch, 1)
    assert jnp.allclose(out, ref, atol=2e-3, rtol=2e-3), (out, ref)

    # Case 2: multi-block batch (exercises grid>1, megacore split, remainder padding).
    batch2 = 24
    x2 = jax.random.normal(kx2, (batch2, state_dim_flat), jnp.float32)
    u2 = jax.random.normal(ku2, (batch2, action_dim), jnp.float32)
    out2 = jax.block_until_ready(critic_dense_forward(x2, u2, params))
    ref2 = reference_forward(x2, u2, params)
    assert out2.shape == (batch2, 1)
    assert jnp.allclose(out2, ref2, atol=2e-3, rtol=2e-3), (out2, ref2)

    print("KERNEL_OK")
</pallas_src>

<mosaic_0001>
module attributes {stable_mosaic.version = 11 : i64} {
  func.func @critic_dense_kernel(%arg0: i32, %arg1: memref<2x28xf32, #tpu.memory_space<vmem>>, %arg2: memref<28x512xbf16, #tpu.memory_space<vmem>>, %arg3: memref<1x512xf32, #tpu.memory_space<vmem>>, %arg4: memref<512x384xbf16, #tpu.memory_space<vmem>>, %arg5: memref<28x384xbf16, #tpu.memory_space<vmem>>, %arg6: memref<1x384xf32, #tpu.memory_space<vmem>>, %arg7: memref<1x384xf32, #tpu.memory_space<vmem>>, %arg8: memref<1xf32, #tpu.memory_space<smem>>, %arg9: memref<2x1xf32, #tpu.memory_space<vmem>>) attributes {dimension_semantics = [#tpu.dimension_semantics<parallel>], iteration_bounds = array<i64: 1>, scalar_prefetch = 0 : i64, scratch_operands = 0 : i64, tpu.core_type = #tpu.core_type<tc>, window_params = [{transform_indices = @transform_0, window_bounds = array<i64: 2, 28>}, {pipeline_mode = #tpu.pipeline_mode<synchronous>, transform_indices = @transform_1, window_bounds = array<i64: 28, 512>}, {pipeline_mode = #tpu.pipeline_mode<synchronous>, transform_indices = @transform_2, window_bounds = array<i64: 1, 512>}, {pipeline_mode = #tpu.pipeline_mode<synchronous>, transform_indices = @transform_3, window_bounds = array<i64: 512, 384>}, {pipeline_mode = #tpu.pipeline_mode<synchronous>, transform_indices = @transform_4, window_bounds = array<i64: 28, 384>}, {pipeline_mode = #tpu.pipeline_mode<synchronous>, transform_indices = @transform_5, window_bounds = array<i64: 1, 384>}, {pipeline_mode = #tpu.pipeline_mode<synchronous>, transform_indices = @transform_6, window_bounds = array<i64: 1, 384>}, {transform_indices = @transform_7, window_bounds = array<i64: 1>}, {transform_indices = @transform_8, window_bounds = array<i64: 2, 1>}]} {
    %c0 = arith.constant 0 : index
    %c0_0 = arith.constant 0 : index
    %0 = vector.load %arg1[%c0, %c0_0] : memref<2x28xf32, #tpu.memory_space<vmem>>, vector<2x28xf32>
    %1 = arith.truncf %0 : vector<2x28xf32> to vector<2x28xbf16>
    %c0_1 = arith.constant 0 : index
    %c0_2 = arith.constant 0 : index
    %2 = vector.load %arg2[%c0_1, %c0_2] : memref<28x512xbf16, #tpu.memory_space<vmem>>, vector<28x512xbf16>
    %cst = arith.constant dense<0.000000e+00> : vector<2x512xf32>
    %3 = tpu.matmul %1, %2, %cst {dimension_numbers = #tpu.dot_dimension_numbers<[1], [0], [0], [1], [0, 0, 1, 1], [], []>} : vector<2x28xbf16>, vector<28x512xbf16>, vector<2x512xf32> -> vector<2x512xf32>
    %c0_3 = arith.constant 0 : index
    %c0_4 = arith.constant 0 : index
    %4 = vector.load %arg3[%c0_3, %c0_4] : memref<1x512xf32, #tpu.memory_space<vmem>>, vector<1x512xf32>
    %5 = vector.broadcast %4 : vector<1x512xf32> to vector<2x512xf32>
    %6 = arith.addf %3, %5 : vector<2x512xf32>
    %cst_5 = arith.constant 0.000000e+00 : f32
    %7 = vector.broadcast %cst_5 : f32 to vector<2x512xf32>
    %8 = arith.maximumf %6, %7 : vector<2x512xf32>
    %9 = arith.truncf %8 : vector<2x512xf32> to vector<2x512xbf16>
    %c0_6 = arith.constant 0 : index
    %c0_7 = arith.constant 0 : index
    %10 = vector.load %arg4[%c0_6, %c0_7] : memref<512x384xbf16, #tpu.memory_space<vmem>>, vector<512x384xbf16>
    %cst_8 = arith.constant dense<0.000000e+00> : vector<2x384xf32>
    %11 = tpu.matmul %9, %10, %cst_8 {dimension_numbers = #tpu.dot_dimension_numbers<[1], [0], [0], [1], [0, 0, 1, 1], [], []>} : vector<2x512xbf16>, vector<512x384xbf16>, vector<2x384xf32> -> vector<2x384xf32>
    %c0_9 = arith.constant 0 : index
    %c0_10 = arith.constant 0 : index
    %12 = vector.load %arg5[%c0_9, %c0_10] : memref<28x384xbf16, #tpu.memory_space<vmem>>, vector<28x384xbf16>
    %cst_11 = arith.constant dense<0.000000e+00> : vector<2x384xf32>
    %13 = tpu.matmul %1, %12, %cst_11 {dimension_numbers = #tpu.dot_dimension_numbers<[1], [0], [0], [1], [0, 0, 1, 1], [], []>} : vector<2x28xbf16>, vector<28x384xbf16>, vector<2x384xf32> -> vector<2x384xf32>
    %14 = arith.addf %11, %13 : vector<2x384xf32>
    %c0_12 = arith.constant 0 : index
    %c0_13 = arith.constant 0 : index
    %15 = vector.load %arg6[%c0_12, %c0_13] : memref<1x384xf32, #tpu.memory_space<vmem>>, vector<1x384xf32>
    %16 = vector.broadcast %15 : vector<1x384xf32> to vector<2x384xf32>
    %17 = arith.addf %14, %16 : vector<2x384xf32>
    %cst_14 = arith.constant 0.000000e+00 : f32
    %18 = vector.broadcast %cst_14 : f32 to vector<2x384xf32>
    %19 = arith.maximumf %17, %18 : vector<2x384xf32>
    %c0_15 = arith.constant 0 : index
    %c0_16 = arith.constant 0 : index
    %20 = vector.load %arg7[%c0_15, %c0_16] : memref<1x384xf32, #tpu.memory_space<vmem>>, vector<1x384xf32>
    %21 = vector.broadcast %20 : vector<1x384xf32> to vector<2x384xf32>
    %22 = arith.mulf %19, %21 : vector<2x384xf32>
    %cst_17 = arith.constant dense<0.000000e+00> : vector<2xf32>
    %23 = vector.multi_reduction <add>, %22, %cst_17 [1] : vector<2x384xf32> to vector<2xf32>
    %24 = vector.shape_cast %23 : vector<2xf32> to vector<2x1xf32>
    %c0_18 = arith.constant 0 : index
    %25 = memref.load %arg8[%c0_18] : memref<1xf32, #tpu.memory_space<smem>>
    %26 = vector.broadcast %25 : f32 to vector<2x1xf32>
    %27 = arith.addf %24, %26 : vector<2x1xf32>
    %c0_19 = arith.constant 0 : index
    %c0_20 = arith.constant 0 : index
    %28 = vector.load %arg9[%c0_19, %c0_20] : memref<2x1xf32, #tpu.memory_space<vmem>>, vector<2x1xf32>
    tpu.vector_store %arg9[%c0_19, %c0_20], %27 {strides = array<i32>} : memref<2x1xf32, #tpu.memory_space<vmem>>, vector<2x1xf32>,
    return
  }
  func.func @transform_0(%arg0: i32) -> (i32, i32) {
    %c0_i32 = arith.constant 0 : i32
    %c0_i32_0 = arith.constant 0 : i32
    return %arg0, %c0_i32 : i32, i32
  }
  func.func @transform_1(%arg0: i32) -> (i32, i32) {
    %c0_i32 = arith.constant 0 : i32
    %c0_i32_0 = arith.constant 0 : i32
    %c0_i32_1 = arith.constant 0 : i32
    return %c0_i32, %c0_i32_0 : i32, i32
  }
  func.func @transform_2(%arg0: i32) -> (i32, i32) {
    %c0_i32 = arith.constant 0 : i32
    %c0_i32_0 = arith.constant 0 : i32
    %c0_i32_1 = arith.constant 0 : i32
    return %c0_i32, %c0_i32_0 : i32, i32
  }
  func.func @transform_3(%arg0: i32) -> (i32, i32) {
    %c0_i32 = arith.constant 0 : i32
    %c0_i32_0 = arith.constant 0 : i32
    %c0_i32_1 = arith.constant 0 : i32
    return %c0_i32, %c0_i32_0 : i32, i32
  }
  func.func @transform_4(%arg0: i32) -> (i32, i32) {
    %c0_i32 = arith.constant 0 : i32
    %c0_i32_0 = arith.constant 0 : i32
    %c0_i32_1 = arith.constant 0 : i32
    return %c0_i32, %c0_i32_0 : i32, i32
  }
  func.func @transform_5(%arg0: i32) -> (i32, i32) {
    %c0_i32 = arith.constant 0 : i32
    %c0_i32_0 = arith.constant 0 : i32
    %c0_i32_1 = arith.constant 0 : i32
    return %c0_i32, %c0_i32_0 : i32, i32
  }
  func.func @transform_6(%arg0: i32) -> (i32, i32) {
    %c0_i32 = arith.constant 0 : i32
    %c0_i32_0 = arith.constant 0 : i32
    %c0_i32_1 = arith.constant 0 : i32
    return %c0_i32, %c0_i32_0 : i32, i32
  }
  func.func @transform_7(%arg0: i32) -> i32 {
    %c0_i32 = arith.constant 0 : i32
    %c0_i32_0 = arith.constant 0 : i32
    return %c0_i32 : i32
  }
  func.func @transform_8(%arg0: i32) -> (i32, i32) {
    %c0_i32 = arith.constant 0 : i32
    %c0_i32_0 = arith.constant 0 : i32
    return %arg0, %c0_i32 : i32, i32
  }
}

</mosaic_0001>

<bundles_post_ra>
// kernel: tpu_custom_call.1
= control target key start
LH: loop header
LB: loop body
LE: loop exit
PB: predicated region body
PF: predicated region fallthrough
CT: control target
= control target key end

     0   :  { %14 = vsyncpa [#allocation4], 0  ;;  %s1841_s0 = inlined_call_operand.hbm [shape: f32[2,28], index: 0, kind: input, shape index: {}]   ;;  %s1842_s1 = inlined_call_operand.hbm [shape: bf16[28,512], index: 1, kind: input, shape index: {}]   ;;  %s1843_s2 = inlined_call_operand.vmem [shape: f32[1,512], index: 2, kind: input, shape index: {}]   ;;  %s1844_s3 = inlined_call_operand.hbm [shape: bf16[512,384], index: 3, kind: input, shape index: {}]   ;;  %s1845_s4 = inlined_call_operand.hbm [shape: bf16[28,384], index: 4, kind: input, shape index: {}]   ;;  %s1846_s5 = inlined_call_operand.vmem [shape: f32[1,384], index: 5, kind: input, shape index: {}]   ;;  %s1847_s6 = inlined_call_operand.vmem [shape: f32[1,384], index: 6, kind: input, shape index: {}]   ;;  %s1848_s7 = inlined_call_operand.<no memory space> [shape: f32[1], index: 7, kind: input, shape index: {}]   ;;  %s1849_s8 = inlined_call_operand.vmem [shape: f32[2,1], index: 8, kind: output, shape index: {}]  }
   0x1   :  { %15 = vsyncpa [#allocation6], 0 }
   0x2   :  { %16 = vsyncpa [#allocation9], 0  ;;  %s1676_s27 = smov [#allocation5]   ;;  %s1582_s9 = scalar_lea.hbm %s1842_s1, 1024 }
   0x3   :  { %s32_s28 = sshll.u32 %s1676_s27, 4  ;;  %p1583_p0 = scmp.ne.s32.totalorder %s1842_s1, %s1582_s9  ;;  %s33_s28 = int_to_ptr.vmem [resolvable:$true] %s32_s28 }
   0x4   :  { %p1586_p1 = scmp.lt.u32.totalorder %s1582_s9, %s1842_s1 }
   0x6   :  { %p1588_p2 = pnand %p1586_p1, %p1583_p0 }
   0x8   :  { %1591 = shalt.err (!%p1588_p2)
}
   0x9   :  { %s1592_s14 = scalar_lea.vmem %s33_s28, 1024  ;;  %p1597_p4 = scmp.lt.s32.totalorder %s33_s28, %s33_s28 }
   0xa   :  { %p1593_p3 = scmp.ne.s32.totalorder %s33_s28, %s1592_s14  ;;  %p1598_p5 = scmp.lt.s32.totalorder %s1592_s14, %s1592_s14 }
   0xc   :  { %p1599_p6 = por %p1598_p5, %p1597_p4 }
   0xe   :  { %p1600_p7 = pnand %p1599_p6, %p1593_p3 }
  0x10   :  { %1603 = shalt.err (!%p1600_p7)
}
  0x11   :  { %s1677_s15 = smov 256   ;;  %s1678_s16 = smov 16  }
  0x12   :  { %38 = dma.hbm_to_vmem [thread:$0]  %s1842_s1, 1024, %s33_s28, [#allocation6], %s1677_s15, %s1677_s15, %s1678_s16  }
  0x13   :  { %s1679_s19 = smov [#allocation3]   ;;  %s1680_s21 = smov [#allocation7]  }
  0x14   :  { %s23_s20 = sshll.u32 %s1679_s19, 4  ;;  %s46_s22 = sshll.u32 %s1680_s21, 4  ;;  %s24_s20 = int_to_ptr.vmem [resolvable:$true] %s23_s20  ;;  %s47_s22 = int_to_ptr.vmem [resolvable:$true] %s46_s22 }
  0x15   :  { %s1604_s25 = scalar_lea.hbm %s1841_s0, 32 }
  0x16   :  { %p1605_p8 = scmp.ne.s32.totalorder %s1841_s0, %s1604_s25  ;;  %p1608_p9 = scmp.lt.u32.totalorder %s1604_s25, %s1841_s0 }
  0x18   :  { %p1610_p10 = pnand %p1608_p9, %p1605_p8 }
  0x1a   :  { %1613 = shalt.err (!%p1610_p10)
}
  0x1b   :  { %s1614_s1 = scalar_lea.vmem %s24_s20, 32  ;;  %p1619_p12 = scmp.lt.s32.totalorder %s24_s20, %s24_s20 }
  0x1c   :  { %p1615_p11 = scmp.ne.s32.totalorder %s24_s20, %s1614_s1  ;;  %p1620_p13 = scmp.lt.s32.totalorder %s1614_s1, %s1614_s1 }
  0x1e   :  { %p1621_p0 = por %p1620_p13, %p1619_p12 }
  0x20   :  { %p1622_p1 = pnand %p1621_p0, %p1615_p11 }
  0x22   :  { %1625 = shalt.err (!%p1622_p1)
}
  0x23   :  { %26 = dma.hbm_to_vmem [thread:$0]  %s1841_s0, 32, %s24_s20, [#allocation4]  }
  0x24   :  { %s1626_s12 = scalar_lea.hbm %s1844_s3, 12288 }
  0x25   :  { %p1627_p2 = scmp.ne.s32.totalorder %s1844_s3, %s1626_s12  ;;  %p1630_p3 = scmp.lt.u32.totalorder %s1626_s12, %s1844_s3 }
  0x27   :  { %p1632_p4 = pnand %p1630_p3, %p1627_p2 }
  0x29   :  { %1635 = shalt.err (!%p1632_p4)
}
  0x2a   :  { %s1636_s17 = scalar_lea.vmem %s47_s22, 12288  ;;  %p1641_p6 = scmp.lt.s32.totalorder %s47_s22, %s47_s22 }
  0x2b   :  { %p1637_p5 = scmp.ne.s32.totalorder %s47_s22, %s1636_s17  ;;  %p1642_p7 = scmp.lt.s32.totalorder %s1636_s17, %s1636_s17 }
  0x2d   :  { %p1643_p8 = por %p1642_p7, %p1641_p6 }
  0x2f   :  { %p1644_p9 = pnand %p1643_p8, %p1637_p5 }
  0x31   :  { %1647 = shalt.err (!%p1644_p9)
}
  0x32   :  { %s1681_s0 = smov 192   ;;  %s1682_s18 = smov 12  }
  0x33   :  { %52 = dma.hbm_to_vmem [thread:$0]  %s1844_s3, 12288, %s47_s22, [#allocation6], %s1681_s0, %s1681_s0, %s1682_s18  }
  0x34   :  { %s1683_s21 = smov [#allocation8]   ;;  %s1648_s26 = scalar_lea.hbm %s1845_s4, 768 }
  0x35   :  { %s58_s23 = sshll.u32 %s1683_s21, 4  ;;  %p1649_p10 = scmp.ne.s32.totalorder %s1845_s4, %s1648_s26  ;;  %s59_s23 = int_to_ptr.vmem [resolvable:$true] %s58_s23 }
  0x36   :  { %p1652_p11 = scmp.lt.u32.totalorder %s1648_s26, %s1845_s4 }
  0x38   :  { %p1654_p12 = pnand %p1652_p11, %p1649_p10 }
  0x3a   :  { %1657 = shalt.err (!%p1654_p12)
}
  0x3b   :  { %s1658_s28 = scalar_lea.vmem %s59_s23, 768  ;;  %p1663_p0 = scmp.lt.s32.totalorder %s59_s23, %s59_s23 }
  0x3c   :  { %p1659_p13 = scmp.ne.s32.totalorder %s59_s23, %s1658_s28  ;;  %p1664_p1 = scmp.lt.s32.totalorder %s1658_s28, %s1658_s28 }
  0x3e   :  { %p1665_p2 = por %p1664_p1, %p1663_p0 }
  0x40   :  { %p1666_p3 = pnand %p1665_p2, %p1659_p13 }
  0x42   :  { %1669 = shalt.err (!%p1666_p3)
}
  0x43   :  { %64 = dma.hbm_to_vmem [thread:$0]  %s1845_s4, 768, %s59_s23, [#allocation9], %s1681_s0, %s1681_s0, %s1682_s18  }
  0x44   :  { %1670 = dma.done.wait [#allocation4], 32  }
  0x45   :  { %1671 = vsyncadd [#allocation4], 4294967264 }
  0x46   :  { %1672 = dma.done.wait [#allocation6], 13312  }
  0x47   :  { %1673 = vsyncadd [#allocation6], 4294953984 }
  0x48   :  { %1674 = dma.done.wait [#allocation9], 768  }
  0x49   :  { %1675 = vsyncadd [#allocation9], 4294966528  ;;  %v1684_v0 = vmov 0   ;;  %v1434_v1 = vld [vmem:[#allocation5 + $0x4] ss:$16 sps:$4 sm:$0xff]   ;;  %vm156_vm0 = vcmask 1045504  }
  0x4a   :  { %201 = vmatprep.mubr.bf16.mxu0 %v1684_v0  ;;  %242 = vmatprep.mubr.bf16.mxu1 %v1684_v0  ;;  %v1436_v2 = vld [vmem:[#allocation5 + $0xc] ss:$16 sps:$4 sm:$0xff]   ;;  %v1438_v3 = vld [vmem:[#allocation5] ss:$16 sps:$4 sm:$0xff]   ;;  %v1439_v4 = vld [vmem:[#allocation5 + $0x8] ss:$16 sps:$4 sm:$0xff]  }
  0x4b   :  { %169 = vmatprep.subr.bf16.mxu0 %v1434_v1  ;;  %vm152_vm1 = vcmask 228352   ;;  %210 = vmatprep.subr.bf16.mxu1 %v1436_v2  ;;  %v1440_v5 = vld [vmem:[#allocation5 + $0x24] ss:$16 sps:$4 sm:$0x3f]   ;;  %v84_v9 = vld [vmem:[#allocation3] sm:$0x3] }
  0x4c   :  { %170 = vmatpush1.bf16.msra.mxu0 %v1438_v3  ;;  %211 = vmatpush1.bf16.msra.mxu1 %v1439_v4  ;;  %v1442_v6 = vld [vmem:[#allocation5 + $0x2c] ss:$16 sps:$4 sm:$0x3f]   ;;  %v1444_v7 = vld [vmem:[#allocation5 + $0x20] ss:$16 sps:$4 sm:$0x3f]   ;;  %v85_v13 = vpack.c.bf16 %v84_v9, %v84_v9 }
  0x4d   :  { %1259 = vmatprep.subr.msk.bf16.mxu0 %vm156_vm0, %v1440_v5  ;;  %v1445_v8 = vld [vmem:[#allocation5 + $0x28] ss:$16 sps:$4 sm:$0x3f]   ;;  %1261 = vmatprep.subr.msk.bf16.mxu1 %vm156_vm0, %v1442_v6  ;;  %v1446_v10 = vld [vmem:[#allocation8] ss:$12 sps:$4 sm:$0xff]   ;;  %v158_v11 = vsel %vm156_vm0, %v1444_v7, 0 }
  0x4e   :  { %v164_v12 = vsel %vm156_vm0, %v1445_v8, 0  ;;  %v1448_v14 = vld [vmem:[#allocation8 + $0x4] ss:$12 sps:$4 sm:$0xff]   ;;  %v1449_v15 = vld [vmem:[#allocation8 + $0x8] ss:$12 sps:$4 sm:$0xff]   ;;  %v1685_v16 = vmov 0.0  }
  0x4f   :  { %v1450_v17 = vld [vmem:[#allocation8 + $0x1c] ss:$12 sps:$4 sm:$0x3f]   ;;  %v1452_v18 = vld [vmem:[#allocation8 + $0x18] ss:$12 sps:$4 sm:$0x3f]  }
  0x50   :  { %172 = vmatpush1.bf16.msra.mxu0 %v158_v11  ;;  %213 = vmatpush1.bf16.msra.mxu1 %v164_v12  ;;  %v1453_v19 = vld [vmem:[#allocation8 + $0x20] ss:$12 sps:$4 sm:$0x3f]   ;;  %v425_v20 = vsel %vm156_vm0, %v1452_v18, 0  ;;  %v1456_v22 = vld [vmem:[#allocation7 + $0x4] ss:$12 sps:$4 sm:$0xff]  }
  0x51   :  { %433 = vmatprep.subr.bf16.mxu0 %v1448_v14  ;;  %1415 = vmatprep.subr.bf16.mxu1 %v1685_v16  ;;  %v431_v21 = vsel %vm156_vm0, %v1453_v19, 0  ;;  %v1459_v23 = vld [vmem:[#allocation7 + $0x184] ss:$12 sps:$4 sm:$0xff]   ;;  %vm1686_vm2 = vmmov 0   ;;  %v1454_v24 = vld [vmem:[#allocation7] ss:$12 sps:$4 sm:$0xff]  }
  0x52   :  { %v1457_v25 = vld [vmem:[#allocation7 + $0x180] ss:$12 sps:$4 sm:$0xff]   ;;  %v1462_v26 = vld [vmem:[#allocation7 + $0x1c] ss:$12 sps:$4 sm:$0xff]   ;;  %v1460_v28 = vld [vmem:[#allocation7 + $0x18] ss:$12 sps:$4 sm:$0xff]  }
  0x53   :  { %1260 = vmatmul.mubr.msk.bf16.vlgmr.msra.gmra.mrb[0].mxu0 %vm152_vm1, %v85_v13  ;;  %1262 = vmatmul.mubr.msk.bf16.vlgmr.msra.gmra.mrb[0].mxu1 %vm152_vm1, %v85_v13  ;;  %v1465_v27 = vld [vmem:[#allocation7 + $0x19c] ss:$12 sps:$4 sm:$0xff]   ;;  %v1463_v29 = vld [vmem:[#allocation7 + $0x198] ss:$12 sps:$4 sm:$0xff]   ;;  %v1468_v30 = vld [vmem:[#allocation7 + $0x34] ss:$12 sps:$4 sm:$0xff]  }
  0x54   :  { %434 = vmatpush1.bf16.msra.mxu0 %v1446_v10  ;;  %1416 = vmatpush3.bf16.msra.mxu1 %v1449_v15  ;;  %v1471_v31 = vld [vmem:[#allocation7 + $0x1b4] ss:$12 sps:$4 sm:$0xff]   ;;  %v1466_v32 = vld [vmem:[#allocation7 + $0x30] ss:$12 sps:$4 sm:$0xff]   ;;  %v1474_v34 = vld [vmem:[#allocation7 + $0x4c] ss:$12 sps:$4 sm:$0xff]  }
  0x55   :  { %1269 = vmatprep.subr.msk.bf16.mxu0 %vm156_vm0, %v1450_v17  ;;  %1417 = vmatprep.subr.bf16.mxu1 %v1685_v16  ;;  %v1469_v33 = vld [vmem:[#allocation7 + $0x1b0] ss:$12 sps:$4 sm:$0xff]   ;;  %v1477_v35 = vld [vmem:[#allocation7 + $0x1cc] ss:$12 sps:$4 sm:$0xff]   ;;  %v1472_v36 = vld [vmem:[#allocation7 + $0x48] ss:$12 sps:$4 sm:$0xff]  }
  0x56   :  { %465 = vmatprep.mubr.bf16.mxu0 %v1684_v0  ;;  %1419 = vmatprep.mubr.msk.bf16.mxu1 %vm1686_vm2, %v1685_v16  ;;  %v1475_v37 = vld [vmem:[#allocation7 + $0x1c8] ss:$12 sps:$4 sm:$0xff]   ;;  %v1480_v38 = vld [vmem:[#allocation7 + $0x64] ss:$12 sps:$4 sm:$0xff]   ;;  %v1478_v40 = vld [vmem:[#allocation7 + $0x60] ss:$12 sps:$4 sm:$0xff]  }
  0x57   :  { %v1483_v39 = vld [vmem:[#allocation7 + $0x1e4] ss:$12 sps:$4 sm:$0xff]   ;;  %v1481_v41 = vld [vmem:[#allocation7 + $0x1e0] ss:$12 sps:$4 sm:$0xff]   ;;  %v1486_v42 = vld [vmem:[#allocation7 + $0x7c] ss:$12 sps:$4 sm:$0xff]  }
  0x58   :  { %436 = vmatpush1.bf16.msra.mxu0 %v425_v20  ;;  %1418 = vmatpush3.bf16.msra.mxu1 %v431_v21  ;;  %v1489_v43 = vld [vmem:[#allocation7 + $0x1fc] ss:$12 sps:$4 sm:$0xff]   ;;  %v1484_v44 = vld [vmem:[#allocation7 + $0x78] ss:$12 sps:$4 sm:$0xff]   ;;  %v1492_v46 = vld [vmem:[#allocation7 + $0x94] ss:$12 sps:$4 sm:$0xff]  }
  0x59   :  { %1026 = vmatprep.subr.bf16.mxu0 %v1456_v22  ;;  %1067 = vmatprep.subr.bf16.mxu1 %v1459_v23  ;;  %v1487_v45 = vld [vmem:[#allocation7 + $0x1f8] ss:$12 sps:$4 sm:$0xff]   ;;  %v1495_v47 = vld [vmem:[#allocation7 + $0x214] ss:$12 sps:$4 sm:$0xff]   ;;  %v1490_v48 = vld [vmem:[#allocation7 + $0x90] ss:$12 sps:$4 sm:$0xff]  }
  0x5a   :  { %v1493_v49 = vld [vmem:[#allocation7 + $0x210] ss:$12 sps:$4 sm:$0xff]   ;;  %v1498_v50 = vld [vmem:[#allocation7 + $0xac] ss:$12 sps:$4 sm:$0xff]   ;;  %v1496_v52 = vld [vmem:[#allocation7 + $0xa8] ss:$12 sps:$4 sm:$0xff]  }
  0x5b   :  { %1270 = vmatmul.mubr.msk.bf16.vlgmr.msra.gmra.mrb[4].mxu0 %vm152_vm1, %v85_v13  ;;  %1420 = vmatmul.mubr.msk.bf16.vlgmr.msra.gmra.mrb[4].mxu1 %vm152_vm1, %v85_v13  ;;  %v1501_v51 = vld [vmem:[#allocation7 + $0x22c] ss:$12 sps:$4 sm:$0xff]   ;;  %v1499_v53 = vld [vmem:[#allocation7 + $0x228] ss:$12 sps:$4 sm:$0xff]   ;;  %v1504_v54 = vld [vmem:[#allocation7 + $0xc4] ss:$12 sps:$4 sm:$0xff]  }
  0x5c   :  { %1027 = vmatpush1.bf16.msra.mxu0 %v1454_v24  ;;  %1068 = vmatpush1.bf16.msra.mxu1 %v1457_v25  ;;  %v1507_v55 = vld [vmem:[#allocation7 + $0x244] ss:$12 sps:$4 sm:$0xff]   ;;  %v1502_v56 = vld [vmem:[#allocation7 + $0xc0] ss:$12 sps:$4 sm:$0xff]   ;;  %v1510_v58 = vld [vmem:[#allocation7 + $0xdc] ss:$12 sps:$4 sm:$0xff]   ;;  %v96_v24 = vlaneseq }
  0x5d   :  { %1028 = vmatprep.subr.bf16.mxu0 %v1462_v26  ;;  %1069 = vmatprep.subr.bf16.mxu1 %v1465_v27  ;;  %v1505_v57 = vld [vmem:[#allocation7 + $0x240] ss:$12 sps:$4 sm:$0xff]   ;;  %v1513_v59 = vld [vmem:[#allocation7 + $0x25c] ss:$12 sps:$4 sm:$0xff]   ;;  %v1508_v60 = vld [vmem:[#allocation7 + $0xd8] ss:$12 sps:$4 sm:$0xff]  }
  0x5e   :  { %v1511_v61 = vld [vmem:[#allocation7 + $0x258] ss:$12 sps:$4 sm:$0xff]   ;;  %v1516_v62 = vld [vmem:[#allocation7 + $0xf4] ss:$12 sps:$4 sm:$0xff]   ;;  %v1514_v0 = vld [vmem:[#allocation7 + $0xf0] ss:$12 sps:$4 sm:$0xff]  }
  0x5f   :  { %v1519_v63 = vld [vmem:[#allocation7 + $0x274] ss:$12 sps:$4 sm:$0xff]   ;;  %v1517_v1 = vld [vmem:[#allocation7 + $0x270] ss:$12 sps:$4 sm:$0xff]   ;;  %v1522_v2 = vld [vmem:[#allocation7 + $0x10c] ss:$12 sps:$4 sm:$0xff]  }
  0x60   :  { %1029 = vmatpush1.bf16.msra.mxu0 %v1460_v28  ;;  %1070 = vmatpush1.bf16.msra.mxu1 %v1463_v29  ;;  %v1525_v3 = vld [vmem:[#allocation7 + $0x28c] ss:$12 sps:$4 sm:$0xff]   ;;  %v1520_v4 = vld [vmem:[#allocation7 + $0x108] ss:$12 sps:$4 sm:$0xff]   ;;  %v1528_v6 = vld [vmem:[#allocation7 + $0x124] ss:$12 sps:$4 sm:$0xff]  }
  0x61   :  { %1030 = vmatprep.subr.bf16.mxu0 %v1468_v30  ;;  %1071 = vmatprep.subr.bf16.mxu1 %v1471_v31  ;;  %v1523_v5 = vld [vmem:[#allocation7 + $0x288] ss:$12 sps:$4 sm:$0xff]   ;;  %v1531_v7 = vld [vmem:[#allocation7 + $0x2a4] ss:$12 sps:$4 sm:$0xff]   ;;  %v1526_v8 = vld [vmem:[#allocation7 + $0x120] ss:$12 sps:$4 sm:$0xff]  }
  0x62   :  { %v1529_v9 = vld [vmem:[#allocation7 + $0x2a0] ss:$12 sps:$4 sm:$0xff]   ;;  %v1534_v10 = vld [vmem:[#allocation7 + $0x13c] ss:$12 sps:$4 sm:$0xff]   ;;  %v1532_v12 = vld [vmem:[#allocation7 + $0x138] ss:$12 sps:$4 sm:$0xff]  }
  0x63   :  { %v1537_v11 = vld [vmem:[#allocation7 + $0x2bc] ss:$12 sps:$4 sm:$0xff]   ;;  %v1535_v13 = vld [vmem:[#allocation7 + $0x2b8] ss:$12 sps:$4 sm:$0xff]   ;;  %v1540_v14 = vld [vmem:[#allocation7 + $0x154] ss:$12 sps:$4 sm:$0xff]  }
  0x64   :  { %1031 = vmatpush1.bf16.msra.mxu0 %v1466_v32  ;;  %1072 = vmatpush1.bf16.msra.mxu1 %v1469_v33  ;;  %v1543_v15 = vld [vmem:[#allocation7 + $0x2d4] ss:$12 sps:$4 sm:$0xff]   ;;  %v1538_v16 = vld [vmem:[#allocation7 + $0x150] ss:$12 sps:$4 sm:$0xff]   ;;  %v1546_v18 = vld [vmem:[#allocation7 + $0x16c] ss:$12 sps:$4 sm:$0xff]  }
  0x65   :  { %1032 = vmatprep.subr.bf16.mxu0 %v1474_v34  ;;  %1073 = vmatprep.subr.bf16.mxu1 %v1477_v35  ;;  %v1541_v17 = vld [vmem:[#allocation7 + $0x2d0] ss:$12 sps:$4 sm:$0xff]   ;;  %v1549_v19 = vld [vmem:[#allocation7 + $0x2ec] ss:$12 sps:$4 sm:$0xff]   ;;  %v1544_v20 = vld [vmem:[#allocation7 + $0x168] ss:$12 sps:$4 sm:$0xff]  }
  0x66   :  { %v1547_v21 = vld [vmem:[#allocation7 + $0x2e8] ss:$12 sps:$4 sm:$0xff]   ;;  %v97_v25 = vshrl.u32 %v96_v24, 7  ;;  %v94_v28 = vld [vmem:[%s1843_s2] sm:$0xf]  ;;  %vm1231_vm3 = vcmask 1041408  }
  0x67   :  { %v1550_v22 = vld [vmem:[#allocation7 + $0xc8] ss:$12 sps:$4 sm:$0xff]   ;;  %v1577_v24 = vld [vmem:[#allocation7 + $0x218] ss:$12 sps:$4 sm:$0xff]   ;;  %vm1242_vm4 = vcmask 1024  }
  0x68   :  { %1033 = vmatpush1.bf16.msra.mxu0 %v1472_v36  ;;  %1074 = vmatpush1.bf16.msra.mxu1 %v1475_v37  ;;  %v1551_v23 = vld [vmem:[#allocation7 + $0x248] ss:$12 sps:$4 sm:$0xff]   ;;  %v1791_v26 = vsub.s32 0, %v97_v25  ;;  %v1793_v27 = vsub.s32 2, %v97_v25  ;;  %v1798_v29 = vsub.s32 1, %v97_v25  ;;  %v110_v30 = vsub.s32 3, %v97_v25 }
  0x69   :  { %1034 = vmatprep.subr.bf16.mxu0 %v1480_v38  ;;  %1075 = vmatprep.subr.bf16.mxu1 %v1483_v39  ;;  %v1578_v25 = vld [vmem:[#allocation7 + $0x170] ss:$12 sps:$4 sm:$0xff]  }
  0x6a   :  { %v99_v31 = vrot.slane %v94_v28, %v1791_v26  ;;  %v107_v32 = vrot.slane %v94_v28, %v1793_v27  ;;  %v103_v33 = vrot.slane %v94_v28, %v1798_v29  ;;  %v111_v34 = vrot.slane %v94_v28, %v110_v30  ;;  %v1579_v28 = vld [vmem:[#allocation7 + $0x2f0] ss:$12 sps:$4 sm:$0xff]  }
  0x6b   :  { %v1580_v30 = vld [vmem:[#allocation7 + $0xb0] ss:$12 sps:$4 sm:$0xff]  }
  0x6c   :  { %1035 = vmatpush1.bf16.msra.mxu0 %v1478_v40  ;;  %1076 = vmatpush1.bf16.msra.mxu1 %v1481_v41 }
  0x6d   :  { %1036 = vmatprep.subr.bf16.mxu0 %v1486_v42  ;;  %1077 = vmatprep.subr.bf16.mxu1 %v1489_v43 }
  0x70   :  { %1037 = vmatpush1.bf16.msra.mxu0 %v1484_v44  ;;  %1078 = vmatpush1.bf16.msra.mxu1 %v1487_v45 }
  0x71   :  { %1038 = vmatprep.subr.bf16.mxu0 %v1492_v46  ;;  %1079 = vmatprep.subr.bf16.mxu1 %v1495_v47 }
  0x74   :  { %1039 = vmatpush1.bf16.msra.mxu0 %v1490_v48  ;;  %1080 = vmatpush1.bf16.msra.mxu1 %v1493_v49 }
  0x75   :  { %1040 = vmatprep.subr.bf16.mxu0 %v1498_v50  ;;  %1081 = vmatprep.subr.bf16.mxu1 %v1501_v51 }
  0x78   :  { %1041 = vmatpush1.bf16.msra.mxu0 %v1496_v52  ;;  %1082 = vmatpush1.bf16.msra.mxu1 %v1499_v53 }
  0x79   :  { %1042 = vmatprep.subr.bf16.mxu0 %v1504_v54  ;;  %1083 = vmatprep.subr.bf16.mxu1 %v1507_v55  ;;  %v1552_v54 = vld [vmem:[#allocation7 + $0x8] ss:$12 sps:$4 sm:$0xff]  }
  0x7a   :  { %v1553_v55 = vld [vmem:[#allocation7 + $0x188] ss:$12 sps:$4 sm:$0xff]  }
  0x7c   :  { %1043 = vmatpush1.bf16.msra.mxu0 %v1502_v56  ;;  %1084 = vmatpush1.bf16.msra.mxu1 %v1505_v57  ;;  %v1554_v57 = vld [vmem:[#allocation7 + $0xe0] ss:$12 sps:$4 sm:$0xff]  }
  0x7d   :  { %1044 = vmatprep.subr.bf16.mxu0 %v1510_v58  ;;  %1085 = vmatprep.subr.bf16.mxu1 %v1513_v59  ;;  %v1555_v58 = vld [vmem:[#allocation7 + $0x260] ss:$12 sps:$4 sm:$0xff]  }
  0x80   :  { %1045 = vmatpush1.bf16.msra.mxu0 %v1508_v60  ;;  %1086 = vmatpush1.bf16.msra.mxu1 %v1511_v61 }
  0x81   :  { %1046 = vmatprep.subr.bf16.mxu0 %v1516_v62  ;;  %1087 = vmatprep.subr.bf16.mxu1 %v1519_v63  ;;  %v1556_v63 = vld [vmem:[#allocation7 + $0x20] ss:$12 sps:$4 sm:$0xff]  }
  0x84   :  { %1047 = vmatpush1.bf16.msra.mxu0 %v1514_v0  ;;  %1088 = vmatpush1.bf16.msra.mxu1 %v1517_v1  ;;  %v1557_v0 = vld [vmem:[#allocation7 + $0x1a0] ss:$12 sps:$4 sm:$0xff]  }
  0x85   :  { %1048 = vmatprep.subr.bf16.mxu0 %v1522_v2  ;;  %1089 = vmatprep.subr.bf16.mxu1 %v1525_v3  ;;  %v1558_v3 = vld [vmem:[#allocation7 + $0xf8] ss:$12 sps:$4 sm:$0xff]  }
  0x88   :  { %1049 = vmatpush1.bf16.msra.mxu0 %v1520_v4  ;;  %1090 = vmatpush1.bf16.msra.mxu1 %v1523_v5  ;;  %v1559_v4 = vld [vmem:[#allocation7 + $0x278] ss:$12 sps:$4 sm:$0xff]  }
  0x89   :  { %1050 = vmatprep.subr.bf16.mxu0 %v1528_v6  ;;  %1091 = vmatprep.subr.bf16.mxu1 %v1531_v7  ;;  %v1560_v7 = vld [vmem:[#allocation7 + $0x38] ss:$12 sps:$4 sm:$0xff]  }
  0x8c   :  { %1051 = vmatpush1.bf16.msra.mxu0 %v1526_v8  ;;  %1092 = vmatpush1.bf16.msra.mxu1 %v1529_v9  ;;  %v1561_v8 = vld [vmem:[#allocation7 + $0x1b8] ss:$12 sps:$4 sm:$0xff]   ;;  %v1562_v9 = vld [vmem:[#allocation7 + $0x110] ss:$12 sps:$4 sm:$0xff]  }
  0x8d   :  { %1052 = vmatprep.subr.bf16.mxu0 %v1534_v10  ;;  %1093 = vmatprep.subr.bf16.mxu1 %v1537_v11  ;;  %v1563_v10 = vld [vmem:[#allocation7 + $0x290] ss:$12 sps:$4 sm:$0xff]  }
  0x8e   :  { %v1564_v11 = vld [vmem:[#allocation7 + $0x50] ss:$12 sps:$4 sm:$0xff]  }
  0x90   :  { %1053 = vmatpush1.bf16.msra.mxu0 %v1532_v12  ;;  %1094 = vmatpush1.bf16.msra.mxu1 %v1535_v13  ;;  %v1565_v12 = vld [vmem:[#allocation7 + $0x1d0] ss:$12 sps:$4 sm:$0xff]   ;;  %v1566_v13 = vld [vmem:[#allocation7 + $0x128] ss:$12 sps:$4 sm:$0xff]  }
  0x91   :  { %1054 = vmatprep.subr.bf16.mxu0 %v1540_v14  ;;  %1095 = vmatprep.subr.bf16.mxu1 %v1543_v15  ;;  %v1567_v14 = vld [vmem:[#allocation7 + $0x2a8] ss:$12 sps:$4 sm:$0xff]  }
  0x92   :  { %v1568_v15 = vld [vmem:[#allocation7 + $0x68] ss:$12 sps:$4 sm:$0xff]  }
  0x94   :  { %1055 = vmatpush1.bf16.msra.mxu0 %v1538_v16  ;;  %1096 = vmatpush1.bf16.msra.mxu1 %v1541_v17  ;;  %v1569_v16 = vld [vmem:[#allocation7 + $0x1e8] ss:$12 sps:$4 sm:$0xff]   ;;  %v1570_v17 = vld [vmem:[#allocation7 + $0x140] ss:$12 sps:$4 sm:$0xff]  }
  0x95   :  { %1056 = vmatprep.subr.bf16.mxu0 %v1546_v18  ;;  %1097 = vmatprep.subr.bf16.mxu1 %v1549_v19  ;;  %v1571_v18 = vld [vmem:[#allocation7 + $0x2c0] ss:$12 sps:$4 sm:$0xff]  }
  0x96   :  { %v1572_v19 = vld [vmem:[#allocation7 + $0x80] ss:$12 sps:$4 sm:$0xff]  }
  0x98   :  { %1057 = vmatpush1.bf16.msra.mxu0 %v1544_v20  ;;  %1098 = vmatpush1.bf16.msra.mxu1 %v1547_v21  ;;  %v1573_v20 = vld [vmem:[#allocation7 + $0x200] ss:$12 sps:$4 sm:$0xff]   ;;  %v1574_v21 = vld [vmem:[#allocation7 + $0x158] ss:$12 sps:$4 sm:$0xff]  }
  0x99   :  { %1371 = vmatprep.subr.bf16.mxu0 %v1550_v22  ;;  %1393 = vmatprep.subr.bf16.mxu1 %v1551_v23  ;;  %v1575_v22 = vld [vmem:[#allocation7 + $0x2d8] ss:$12 sps:$4 sm:$0xff]  }
  0x9a   :  { %v1576_v23 = vld [vmem:[#allocation7 + $0x98] ss:$12 sps:$4 sm:$0xff]  }
 0x126   :  { %v203_v35 = vpop.f32.mrb[0].mxu0  ;;  %v244_v36 = vpop.f32.mrb[0].mxu1 }
 0x127   :  { %v204_v37 = vadd.f32 %v203_v35, %v99_v31  ;;  %v245_v38 = vadd.f32 %v244_v36, %v107_v32  ;;  %v205_v39 = vpop.f32.mrb[1].mxu0  ;;  %v246_v40 = vpop.f32.mrb[1].mxu1  ;;  %v1581_v31 = vld [vmem:[#allocation7 + $0x230] ss:$12 sps:$4 sm:$0xff]  }
 0x128   :  { %v206_v41 = vadd.f32 %v205_v39, %v103_v33  ;;  %v247_v42 = vadd.f32 %v246_v40, %v111_v34  ;;  %v207_v43 = vpop.f32.mrb[2].mxu0  ;;  %v248_v44 = vpop.f32.mrb[2].mxu1  ;;  %v1188_v32 = vld [vmem:[%s1846_s5] sm:$0x7] }
 0x129   :  { %v251_v45 = vmax.f32 %v204_v37, 0.0  ;;  %v253_v46 = vmax.f32 %v245_v38, 0.0  ;;  %v208_v47 = vpop.f32.mrb[3].mxu0  ;;  %v249_v48 = vpop.f32.mrb[3].mxu1  ;;  %v1193_v36 = vrot.slane %v1188_v32, %v1791_v26  ;;  %v1197_v40 = vrot.slane %v1188_v32, %v1798_v29  ;;  %v1211_v43 = vld [vmem:[%s1847_s6] sm:$0x7] }
 0x12a   :  { %v252_v49 = vmax.f32 %v206_v41, 0.0  ;;  %v254_v50 = vmax.f32 %v247_v42, 0.0 }
 0x12b   :  { %v1803_v51 = vpack.c.bf16 %v253_v46, %v253_v46  ;;  %v1805_v56 = vpack.c.bf16 %v251_v45, %v251_v45 }
 0x12c   :  { %v256_v52 = vpack.c.bf16 %v252_v49, %v252_v49  ;;  %v258_v53 = vpack.c.bf16 %v254_v50, %v254_v50  ;;  %v1216_v49 = vrot.slane %v1211_v43, %v1791_v26 }
 0x12e   :  { %1058 = vmatprep.mubr.bf16.mxu0 %v256_v52  ;;  %1099 = vmatprep.mubr.bf16.mxu1 %v258_v53  ;;  %v1807_v59 = vpop.f32.mrb[4].mxu0  ;;  %v1809_v60 = vpop.f32.mrb[4].mxu1 }
 0x12f   :  { %1059 = vmatmul.mubr.bf16.vlgmr.msra.gmra.mrb[8].mxu0 %v1805_v56  ;;  %1100 = vmatmul.mubr.bf16.vlgmr.msra.gmra.mrb[8].mxu1 %v1803_v51  ;;  %v1813_v61 = vpop.f32.mrb[5].mxu0  ;;  %v1421_v62 = vpop.f32.mrb[5].mxu1 }
 0x130   :  { %1372 = vmatpush3.bf16.msra.mxu0 %v1552_v54  ;;  %1394 = vmatpush3.bf16.msra.mxu1 %v1553_v55  ;;  %v471_v1 = vpop.f32.mrb[6].mxu0  ;;  %v511_v2 = vpop.f32.mrb[6].mxu1 }
 0x131   :  { %1140 = vmatprep.mubr.bf16.mxu0 %v256_v52  ;;  %1180 = vmatprep.mubr.bf16.mxu1 %v258_v53  ;;  %v472_v5 = vpop.f32.mrb[7].mxu0  ;;  %v1422_v6 = vpop.f32.mrb[7].mxu1 }
 0x132   :  { %1373 = vmatprep.subr.bf16.mxu0 %v1554_v57  ;;  %1395 = vmatprep.subr.bf16.mxu1 %v1555_v58  ;;  %v1201_v5 = vrot.slane %v1188_v32, %v1793_v27 }
 0x134   :  { %1374 = vmatpush3.bf16.msra.mxu0 %v1556_v63  ;;  %1396 = vmatpush3.bf16.msra.mxu1 %v1557_v0 }
 0x135   :  { %1375 = vmatprep.subr.bf16.mxu0 %v1558_v3  ;;  %1397 = vmatprep.subr.bf16.mxu1 %v1559_v4 }
 0x138   :  { %1376 = vmatpush3.bf16.msra.mxu0 %v1560_v7  ;;  %1398 = vmatpush3.bf16.msra.mxu1 %v1561_v8  ;;  %v1224_v8 = vrot.slane %v1211_v43, %v1793_v27 }
 0x139   :  { %1377 = vmatprep.subr.bf16.mxu0 %v1562_v9  ;;  %1399 = vmatprep.subr.bf16.mxu1 %v1563_v10 }
 0x13c   :  { %1378 = vmatpush3.bf16.msra.mxu0 %v1564_v11  ;;  %1400 = vmatpush3.bf16.msra.mxu1 %v1565_v12 }
 0x13d   :  { %1379 = vmatprep.subr.bf16.mxu0 %v1566_v13  ;;  %1401 = vmatprep.subr.bf16.mxu1 %v1567_v14  ;;  %v1240_v13 = vstv %s1848_s7 }
 0x140   :  { %1380 = vmatpush3.bf16.msra.mxu0 %v1568_v15  ;;  %1402 = vmatpush3.bf16.msra.mxu1 %v1569_v16 }
 0x141   :  { %1381 = vmatprep.subr.bf16.mxu0 %v1570_v17  ;;  %1403 = vmatprep.subr.bf16.mxu1 %v1571_v18 }
 0x144   :  { %1382 = vmatpush3.bf16.msra.mxu0 %v1572_v19  ;;  %1404 = vmatpush3.bf16.msra.mxu1 %v1573_v20 }
 0x145   :  { %1383 = vmatprep.subr.bf16.mxu0 %v1574_v21  ;;  %1405 = vmatprep.subr.bf16.mxu1 %v1575_v22 }
 0x148   :  { %1384 = vmatpush3.bf16.msra.mxu0 %v1576_v23  ;;  %1406 = vmatpush3.bf16.msra.mxu1 %v1577_v24 }
 0x149   :  { %1385 = vmatprep.subr.bf16.mxu0 %v1578_v25  ;;  %1407 = vmatprep.subr.bf16.mxu1 %v1579_v28 }
 0x14c   :  { %1386 = vmatpush3.bf16.msra.mxu0 %v1580_v30  ;;  %1408 = vmatpush3.bf16.msra.mxu1 %v1581_v31 }
 0x14f   :  { %1141 = vmatmul.mubr.bf16.vlgmr.msra.gmra.mrb[12].mxu0 %v1805_v56  ;;  %1181 = vmatmul.mubr.bf16.vlgmr.msra.gmra.mrb[12].mxu1 %v1803_v51  ;;  %v1220_v51 = vrot.slane %v1211_v43, %v1798_v29 }
 0x202   :  { %v1060_v33 = vpop.f32.mrb[8].mxu0  ;;  %v1101_v34 = vpop.f32.mrb[8].mxu1 }
 0x203   :  { %v1061_v35 = vadd.f32 %v1060_v33, %v1807_v59  ;;  %v1062_v37 = vpop.f32.mrb[9].mxu0  ;;  %v1103_v38 = vpop.f32.mrb[9].mxu1 }
 0x204   :  { %v1063_v39 = vadd.f32 %v1062_v37, %v1813_v61  ;;  %v1064_v41 = vpop.f32.mrb[10].mxu0  ;;  %v1105_v42 = vpop.f32.mrb[10].mxu1 }
 0x205   :  { %v1102_v44 = vadd.f32 %v1101_v34, %v1061_v35  ;;  %v1065_v45 = vpop.f32.mrb[11].mxu0  ;;  %v1106_v46 = vpop.f32.mrb[11].mxu1 }
 0x206   :  { %v1104_v47 = vadd.f32 %v1103_v38, %v1063_v39 }
 0x207   :  { %v1205_v48 = vadd.f32 %v1193_v36, %v1102_v44 }
 0x208   :  { %v1206_v50 = vadd.f32 %v1197_v40, %v1104_v47 }
 0x209   :  { %v1208_v52 = vmax.f32 %v1205_v48, 0.0 }
 0x20a   :  { %v1209_v53 = vmax.f32 %v1206_v50, 0.0 }
 0x20b   :  { %v1228_v54 = vmul.f32 %v1216_v49, %v1208_v52 }
 0x20c   :  { %v1229_v55 = vmul.f32 %v1220_v51, %v1209_v53 }
 0x20d   :  { %v1232_v56 = vsel %vm1231_vm3, %v1228_v54, 0.0 }
 0x20e   :  { %v1233_v57 = vsel %vm1231_vm3, %v1229_v55, 0.0 }
 0x20f   :  { %v1234_v58 = vadd.f32 %v1233_v57, %v1232_v56 }
 0x222   :  { %v1387_v59 = vpop.f32.mrb[12].mxu0  ;;  %v1409_v61 = vpop.f32.mrb[12].mxu1 }
 0x223   :  { %v1388_v62 = vpop.f32.mrb[13].mxu0  ;;  %v1410_v63 = vpop.f32.mrb[13].mxu1 }
 0x224   :  { %v1389_v0 = vadd.f32 %v1388_v62, %v1387_v59  ;;  %v1411_v1 = vadd.f32 %v1410_v63, %v1409_v61  ;;  %v1390_v26 = vpop.f32.mrb[14].mxu0  ;;  %v1412_v2 = vpop.f32.mrb[14].mxu1 }
 0x225   :  { %v1391_v3 = vpop.f32.mrb[15].mxu0  ;;  %v1413_v29 = vpop.f32.mrb[15].mxu1 }
 0x226   :  { %v1143_v4 = vadd.f32 %v1389_v0, %v1809_v60 }
 0x228   :  { %v1183_v6 = vadd.f32 %v1411_v1, %v1143_v4 }
 0x22a   :  { %v1207_v7 = vadd.f32 %v1201_v5, %v1183_v6 }
 0x22c   :  { %v1210_v9 = vmax.f32 %v1207_v7, 0.0 }
 0x22e   :  { %v1230_v10 = vmul.f32 %v1224_v8, %v1210_v9 }
 0x230   :  { %v1235_v11 = vsel %vm1231_vm3, %v1230_v10, 0.0 }
 0x231   :  { %v1236_v12 = vadd.f32 %v1235_v11, %v1234_v58 }
 0x233   :  { %1237 = vadd.xlane.f32.xlu0 %v1236_v12 }
 0x2c0   :  { %v1238_v14 = vpop.xlane.xlu0 %1237 }
 0x2c1   :  { %v1241_v15 = vadd.f32 %v1240_v13, %v1238_v14 }
 0x2c3   :  { %1243 = vst.msk [vmem:[%s1849_s8] sm:$0x3] %vm1242_vm4, %v1241_v15 }
 0x2c4   :  { %1248 = vsyncpa [#allocation4], 1 }
 0x2c5   :  { %1249 = vsyncpa [#allocation6], 1 }
 0x2c6   :  { %1250 = vsyncpa [#allocation9], 1 }

</bundles_post_ra>
